<compile_context>
chip_gen: v7x
topology: tpu7x:2x2x1
jax: 0.10.0
libtpu: 0.0.40
codegen_flags: <defaults>
</compile_context>

<pallas_src>
import jax
import jax.numpy as jnp
from jax import lax
from jax.experimental import pallas as pl
from jax.experimental.pallas import tpu as pltpu


_LANE = 128                       # lane width     -> class-tile granularity
_SUBLANE = 8                      # sublane height -> batch-tile granularity
_TM_MAX = 256                     # max batch tile (rows)
_TN_MAX = 512                     # max class tile (cols); safe for v7x VMEM
_STEP_COST = 8                    # grid-step overhead, in "wasted unit-blocks"
_VMEM_BUDGET = 24 * 1024 * 1024   # double-buffered working-set budget
_VMEM_LIMIT = 32 * 1024 * 1024    # scoped VMEM limit handed to Mosaic


def _cdiv(a, b):
    return -(-a // b)


def _pad_axis(a, axis, target):
    pad = target - a.shape[axis]
    if pad <= 0:
        return a
    widths = [(0, 0)] * a.ndim
    widths[axis] = (0, pad)
    return jnp.pad(a, widths)


def _pick_tile(length, unit, max_tile, min_tiles=1):
    """Pick a tile size (a multiple of `unit` and <= max_tile, or the full
    axis) for an axis of `length` elements.

    Trades padded waste against per-grid-step overhead instead of rounding
    the axis up to a large fixed tile (which could nearly double the work).
    Returns (tile, padded_length)."""
    if length <= max_tile and min_tiles <= 1:
        return length, length                    # full-dim block: no padding
    blocks = _cdiv(length, unit)
    max_units = max(1, max_tile // unit)
    best = None
    for d in range(1, min(blocks, max_units) + 1):
        steps = _cdiv(blocks, d)
        if steps < min_tiles:
            continue
        waste = steps * d - blocks               # padded unit-blocks
        cost = steps * _STEP_COST + waste
        if best is None or cost < best[0]:
            best = (cost, d)
    d = best[1] if best is not None else min(blocks, max_units)
    tile = d * unit
    padded = _cdiv(length, tile) * tile
    return tile, padded


# ----------------------------- kernels ------------------------------------ #

def _linear_kernel(x_ref, w_ref, b_ref, o_ref):
    # x: (tm, D), w: (tn, D) -- bf16 straight from HBM, b: (1, tn) f32.
    w = w_ref[...]
    x = x_ref[...]
    if x.dtype != w.dtype:
        x = x.astype(w.dtype)                    # cast the small operand only
    acc = lax.dot_general(                       # contract D; weight stays (C, D)
        x, w, dimension_numbers=(((1,), (1,)), ((), ())),
        preferred_element_type=jnp.float32)
    o_ref[...] = (acc + b_ref[...]).astype(o_ref.dtype)


def _wn_linear_kernel(x_ref, v_ref, scale_ref, b_ref, o_ref):
    # Weight-norm head: the precomputed per-class scale (g/||v||) is applied
    # to the matmul OUTPUT (B*C multiplies) instead of renormalizing the
    # (C, D) weight, and is computed once at init time, not per forward.
    v = v_ref[...]
    x = x_ref[...]
    if x.dtype != v.dtype:
        x = x.astype(v.dtype)
    acc = lax.dot_general(
        x, v, dimension_numbers=(((1,), (1,)), ((), ())),
        preferred_element_type=jnp.float32)
    o_ref[...] = (acc * scale_ref[...] + b_ref[...]).astype(o_ref.dtype)


# ----------------------------- init (once) --------------------------------- #

def feat_classifier_init(params, fc_type="linear", param_dtype=jnp.bfloat16):
    """One-time parameter preparation (analogue of nn.Module.__init__).

    params : 'linear': {'weight': (C, D), 'bias': (C,)}
             'wn'    : {'v': (C, D), 'g': (C, 1), 'bias': (C,)}
    param_dtype : HBM storage dtype of the matmul weight.  bf16 (default)
        halves the dominant HBM stream; pass jnp.float32 for a bit-closer
        f32-weight path (the kernel is mem-bound, so it is still fast).
    """
    if fc_type == "wn":
        v, g, bias = params["v"], params["g"], params["bias"]
        C, D = v.shape
        v32 = v.astype(jnp.float32)
        # scale[c] = g[c] / ||v[c, :]||_2 -- no epsilon, identical to torch
        # weight_norm (an all-zero row of v gives inf there too).
        scale = (g.reshape(C).astype(jnp.float32)
                 * lax.rsqrt(jnp.sum(v32 * v32, axis=1))).reshape(1, C)
        weight = v
    else:
        weight, bias = params["weight"], params["bias"]
        C, D = weight.shape
        scale = None

    # Class-axis tiling depends only on the parameters, so do it here, once.
    # >= 2 class tiles whenever C >= 256 keeps both v7x TensorCores busy.
    tn, Cp = _pick_tile(C, _LANE, _TN_MAX,
                        min_tiles=2 if C >= 2 * _LANE else 1)

    return {
        "type": fc_type,
        "C": C,
        "D": D,
        "tn": tn,
        "Cp": Cp,
        "weight": _pad_axis(weight.astype(param_dtype), 0, Cp),   # (Cp, D)
        "bias": _pad_axis(bias.reshape(1, C).astype(jnp.float32), 1, Cp),
        "scale": None if scale is None else _pad_axis(scale, 1, Cp),
    }


# ----------------------------- forward (hot) ------------------------------- #

def feat_classifier_forward(x, prepared):
    """Forward pass of feat_classifier.  x: (B, projection_dim)."""
    B, D = x.shape
    assert D == prepared["D"], "projection_dim mismatch"
    C, Cp, tn = prepared["C"], prepared["Cp"], prepared["tn"]
    w, b_row, scale_row = prepared["weight"], prepared["bias"], prepared["scale"]

    # Batch tiling: B <= 256 uses the full-dim BlockSpec exception (no pad).
    tm, Bp = _pick_tile(B, _SUBLANE, _TM_MAX, min_tiles=1)

    # VMEM clamp (v7x: 32 MiB scoped / 64 MiB physical per TC).
    def _vmem_bytes(tm_, tn_):
        return 2 * (tm_ * D * x.dtype.itemsize        # x block (double-buffered)
                    + tn_ * D * w.dtype.itemsize      # weight block
                    + tm_ * tn_ * x.dtype.itemsize    # output block
                    + 2 * tn_ * 4)                    # bias/scale rows
    while _vmem_bytes(tm, tn) > _VMEM_BUDGET and tm > _SUBLANE:
        tm = max(_SUBLANE, (tm // 2) // _SUBLANE * _SUBLANE)
        Bp = _cdiv(B, tm) * tm
    # TODO(synk): if tn*D alone overruns VMEM (projection_dim >~ 10K), add a
    # contraction (D) grid axis with an f32 VMEM accumulator + pl.when.

    x_p = _pad_axis(x, 0, Bp)                          # no-op whenever B <= 256

    # Class axis OUTER, batch axis inner: the (tn, D) weight block index is
    # constant across the inner loop, so it is fetched from HBM once per
    # class tile; only the small x tile is re-streamed.
    grid = (Cp // tn, Bp // tm)
    row_spec = pl.BlockSpec((1, tn), lambda c, b: (0, c))
    if prepared["type"] == "wn":
        kernel, rows = _wn_linear_kernel, (scale_row, b_row)
    else:
        kernel, rows = _linear_kernel, (b_row,)

    out = pl.pallas_call(
        kernel,
        out_shape=jax.ShapeDtypeStruct((Bp, Cp), x.dtype),
        grid=grid,
        in_specs=[pl.BlockSpec((tm, D), lambda c, b: (b, 0)),    # x tile
                  pl.BlockSpec((tn, D), lambda c, b: (c, 0))]    # weight tile
                 + [row_spec] * len(rows),                       # (1, tn) rows
        out_specs=pl.BlockSpec((tm, tn), lambda c, b: (b, c)),
        compiler_params=pltpu.CompilerParams(
            dimension_semantics=("parallel", "parallel"),
            vmem_limit_bytes=_VMEM_LIMIT),
    )(x_p, w, *rows)

    if Bp == B and Cp == C:
        return out
    return out[:B, :C]


# ------------------------------ main --------------------------------------- #

if __name__ == "__main__":
    key = jax.random.PRNGKey(0)
    k_x, k_w, k_b = jax.random.split(key, 3)

    batch = 8
    projection_dim = 256     # module default
    class_num = 16

    # Deterministic "nn.Linear"-style init: U(-1/sqrt(D), 1/sqrt(D))
    bound = 1.0 / jnp.sqrt(jnp.float32(projection_dim))
    weight = jax.random.uniform(k_w, (class_num, projection_dim),
                                jnp.float32, -bound, bound)
    bias = jax.random.uniform(k_b, (class_num,), jnp.float32, -bound, bound)
    x = jax.random.normal(k_x, (batch, projection_dim), jnp.float32)

    # ---- type='linear' path (bf16-stored weight, f32 accumulate) ----
    prep_lin = feat_classifier_init({"weight": weight, "bias": bias},
                                    fc_type="linear")
    y_lin = jax.block_until_ready(feat_classifier_forward(x, prep_lin))
    ref_lin = x @ weight.T + bias
    assert y_lin.shape == ref_lin.shape
    assert jnp.allclose(y_lin, ref_lin, atol=2e-2, rtol=2e-2), \
        float(jnp.max(jnp.abs(y_lin - ref_lin)))

    # ---- type='wn' path (torch weight_norm over dim=0) ----
    # weight_norm init: v = weight, g = ||weight||_row -> same forward output.
    g = jnp.sqrt(jnp.sum(weight * weight, axis=1, keepdims=True))    # (C, 1)
    prep_wn = feat_classifier_init({"v": weight, "g": g, "bias": bias},
                                   fc_type="wn")
    y_wn = jax.block_until_ready(feat_classifier_forward(x, prep_wn))
    w_eff = g * weight / jnp.sqrt(jnp.sum(weight * weight, axis=1, keepdims=True))
    ref_wn = x @ w_eff.T + bias
    assert y_wn.shape == ref_wn.shape
    assert jnp.allclose(y_wn, ref_wn, atol=2e-2, rtol=2e-2), \
        float(jnp.max(jnp.abs(y_wn - ref_wn)))

    # ---- optional f32-weight path (closer parity with the f32 reference) ----
    prep_f32 = feat_classifier_init({"weight": weight, "bias": bias},
                                    fc_type="linear", param_dtype=jnp.float32)
    y_f32 = jax.block_until_ready(feat_classifier_forward(x, prep_f32))
    assert jnp.allclose(y_f32, ref_lin, atol=2e-2, rtol=2e-2)

    print("KERNEL_OK")
</pallas_src>

<mosaic_0001>
module attributes {stable_mosaic.version = 11 : i64} {
  func.func @_linear_kernel(%arg0: i32, %arg1: i32, %arg2: memref<8x256xf32, #tpu.memory_space<vmem>>, %arg3: memref<16x256xbf16, #tpu.memory_space<vmem>>, %arg4: memref<1x16xf32, #tpu.memory_space<vmem>>, %arg5: memref<8x16xf32, #tpu.memory_space<vmem>>) attributes {dimension_semantics = [#tpu.dimension_semantics<parallel>, #tpu.dimension_semantics<parallel>], iteration_bounds = array<i64: 1, 1>, scalar_prefetch = 0 : i64, scratch_operands = 0 : i64, tpu.core_type = #tpu.core_type<tc>, window_params = [{transform_indices = @transform_0, window_bounds = array<i64: 8, 256>}, {transform_indices = @transform_1, window_bounds = array<i64: 16, 256>}, {transform_indices = @transform_2, window_bounds = array<i64: 1, 16>}, {transform_indices = @transform_3, window_bounds = array<i64: 8, 16>}]} {
    %c0 = arith.constant 0 : index
    %c0_0 = arith.constant 0 : index
    %0 = vector.load %arg3[%c0, %c0_0] : memref<16x256xbf16, #tpu.memory_space<vmem>>, vector<16x256xbf16>
    %c0_1 = arith.constant 0 : index
    %c0_2 = arith.constant 0 : index
    %1 = vector.load %arg2[%c0_1, %c0_2] : memref<8x256xf32, #tpu.memory_space<vmem>>, vector<8x256xf32>
    %2 = arith.truncf %1 : vector<8x256xf32> to vector<8x256xbf16>
    %cst = arith.constant dense<0.000000e+00> : vector<8x16xf32>
    %3 = tpu.matmul %2, %0, %cst {dimension_numbers = #tpu.dot_dimension_numbers<[1], [1], [0], [0], [0, 0, 1, 0], [], []>} : vector<8x256xbf16>, vector<16x256xbf16>, vector<8x16xf32> -> vector<8x16xf32>
    %c0_3 = arith.constant 0 : index
    %c0_4 = arith.constant 0 : index
    %4 = vector.load %arg4[%c0_3, %c0_4] : memref<1x16xf32, #tpu.memory_space<vmem>>, vector<1x16xf32>
    %5 = vector.broadcast %4 : vector<1x16xf32> to vector<8x16xf32>
    %6 = arith.addf %3, %5 : vector<8x16xf32>
    %c0_5 = arith.constant 0 : index
    %c0_6 = arith.constant 0 : index
    %7 = vector.load %arg5[%c0_5, %c0_6] : memref<8x16xf32, #tpu.memory_space<vmem>>, vector<8x16xf32>
    tpu.vector_store %arg5[%c0_5, %c0_6], %6 {strides = array<i32>} : memref<8x16xf32, #tpu.memory_space<vmem>>, vector<8x16xf32>,
    return
  }
  func.func @transform_0(%arg0: i32, %arg1: i32) -> (i32, i32) {
    %c0_i32 = arith.constant 0 : i32
    %c0_i32_0 = arith.constant 0 : i32
    return %arg1, %c0_i32 : i32, i32
  }
  func.func @transform_1(%arg0: i32, %arg1: i32) -> (i32, i32) {
    %c0_i32 = arith.constant 0 : i32
    %c0_i32_0 = arith.constant 0 : i32
    return %arg0, %c0_i32 : i32, i32
  }
  func.func @transform_2(%arg0: i32, %arg1: i32) -> (i32, i32) {
    %c0_i32 = arith.constant 0 : i32
    %c0_i32_0 = arith.constant 0 : i32
    return %c0_i32, %arg0 : i32, i32
  }
  func.func @transform_3(%arg0: i32, %arg1: i32) -> (i32, i32) {
    %c0_i32 = arith.constant 0 : i32
    return %arg1, %arg0 : i32, i32
  }
}

</mosaic_0001>

<bundles_post_ra>
// kernel: tpu_custom_call.1
= control target key start
LH: loop header
LB: loop body
LE: loop exit
PB: predicated region body
PF: predicated region fallthrough
CT: control target
= control target key end

     0   :  { %8 = vsyncpa [#allocation3], 0  ;;  %s277_s0 = inlined_call_operand.hbm [shape: f32[8,256], index: 0, kind: input, shape index: {}]   ;;  %s278_s1 = inlined_call_operand.hbm [shape: bf16[16,256], index: 1, kind: input, shape index: {}]   ;;  %s279_s2 = inlined_call_operand.vmem [shape: f32[1,16], index: 2, kind: input, shape index: {}]   ;;  %s280_s3 = inlined_call_operand.hbm [shape: f32[8,16], index: 3, kind: output, shape index: {}]  }
   0x1   :  { %9 = vsyncpa [#allocation6], 0 }
   0x2   :  { %10 = vsyncpa [#allocation4], 0  ;;  %s206_s12 = smov [#allocation2]   ;;  %s207_s14 = smov [#allocation5]  }
   0x3   :  { %s17_s13 = sshll.u32 %s206_s12, 4  ;;  %s26_s15 = sshll.u32 %s207_s14, 4  ;;  %s18_s13 = int_to_ptr.vmem [resolvable:$true] %s17_s13  ;;  %s231_s15 = int_to_ptr.vmem [resolvable:$true] %s26_s15 }
   0x4   :  { %s134_s18 = scalar_lea.hbm %s277_s0, 256 }
   0x5   :  { %p135_p0 = scmp.ne.s32.totalorder %s277_s0, %s134_s18  ;;  %p138_p1 = scmp.lt.u32.totalorder %s134_s18, %s277_s0 }
   0x7   :  { %p140_p2 = pnand %p138_p1, %p135_p0 }
   0x9   :  { %143 = shalt.err (!%p140_p2)
}
   0xa   :  { %s144_s23 = scalar_lea.vmem %s18_s13, 256  ;;  %p149_p4 = scmp.lt.s32.totalorder %s18_s13, %s18_s13 }
   0xb   :  { %p145_p3 = scmp.ne.s32.totalorder %s18_s13, %s144_s23  ;;  %p150_p5 = scmp.lt.s32.totalorder %s144_s23, %s144_s23 }
   0xd   :  { %p151_p6 = por %p150_p5, %p149_p4 }
   0xf   :  { %p152_p7 = pnand %p151_p6, %p145_p3 }
  0x11   :  { %155 = shalt.err (!%p152_p7)
}
  0x12   :  { %20 = dma.hbm_to_vmem [thread:$0]  %s277_s0, 256, %s18_s13, [#allocation3]  }
  0x13   :  { %s156_s28 = scalar_lea.hbm %s278_s1, 256 }
  0x14   :  { %p157_p8 = scmp.ne.s32.totalorder %s278_s1, %s156_s28  ;;  %p160_p9 = scmp.lt.u32.totalorder %s156_s28, %s278_s1 }
  0x16   :  { %p162_p10 = pnand %p160_p9, %p157_p8 }
  0x18   :  { %165 = shalt.err (!%p162_p10)
}
  0x19   :  { %s166_s6 = scalar_lea.vmem %s231_s15, 256  ;;  %p171_p12 = scmp.lt.s32.totalorder %s231_s15, %s231_s15 }
  0x1a   :  { %p167_p11 = scmp.ne.s32.totalorder %s231_s15, %s166_s6  ;;  %p172_p13 = scmp.lt.s32.totalorder %s166_s6, %s166_s6 }
  0x1c   :  { %p173_p0 = por %p172_p13, %p171_p12 }
  0x1e   :  { %p174_p1 = pnand %p173_p0, %p167_p11 }
  0x20   :  { %177 = shalt.err (!%p174_p1)
}
  0x21   :  { %s208_s0 = smov 128   ;;  %s209_s7 = smov 8  }
  0x22   :  { %32 = dma.hbm_to_vmem [thread:$0]  %s278_s1, 256, %s231_s15, [#allocation6], %s208_s0, %s208_s0, %s209_s7  }
  0x23   :  { %200 = dma.done.wait [#allocation3], 256  }
  0x24   :  { %201 = vsyncadd [#allocation3], 4294967040 }
  0x25   :  { %202 = dma.done.wait [#allocation6], 256  }
  0x26   :  { %203 = vsyncadd [#allocation6], 4294967040  ;;  %v131_v0 = vld [vmem:[#allocation5 + $0x4] ss:$8 sps:$4 sm:$0xff]   ;;  %v133_v1 = vld [vmem:[#allocation5] ss:$8 sps:$4 sm:$0xff]  }
  0x27   :  { %v45_v2 = vld [vmem:[#allocation2 + $0x8] sm:$0xff]  ;;  %65 = vmatprep.subr.bf16.mxu0 %v131_v0  ;;  %v44_v4 = vld [vmem:[#allocation2] sm:$0xff]  ;;  %s210_s12 = smov [#allocation7]   ;;  %vm105_vm0 = vcmask 130048  }
  0x28   :  { %v47_v3 = vpack.c.bf16 %v45_v2, %v45_v2  ;;  %66 = vmatpush1.bf16.xpose.msra.mxu0 %v133_v1  ;;  %v46_v5 = vpack.c.bf16 %v44_v4, %v44_v4  ;;  %v123_v6 = vld [vmem:[%s279_s2] ss:$0 sm:$0xff]  ;;  %s113_s1 = sshll.u32 %s210_s12, 4  ;;  %s114_s1 = int_to_ptr.vmem [resolvable:$true] %s113_s1 }
  0x29   :  { %s178_s13 = scalar_lea.vmem %s114_s1, 128  ;;  %p183_p3 = scmp.lt.s32.totalorder %s114_s1, %s114_s1 }
  0x2a   :  { %97 = vmatprep.mubr.bf16.mxu0 %v47_v3  ;;  %p179_p2 = scmp.ne.s32.totalorder %s114_s1, %s178_s13  ;;  %p184_p4 = scmp.lt.s32.totalorder %s178_s13, %s178_s13 }
  0x2c   :  { %p185_p5 = por %p184_p4, %p183_p3 }
  0x2e   :  { %p186_p6 = pnand %p185_p5, %p179_p2 }
  0x2f   :  { %98 = vmatmul.mubr.bf16.vlgmr.msra.gmra.mrb[0].mxu0 %v46_v5 }
 0x102   :  { %v99_v7 = vpop.f32.mrb[0].mxu0 }
 0x103   :  { %v100_v8 = vadd.f32 %v123_v6, %v99_v7  ;;  %v101_v9 = vpop.f32.mrb[1].mxu0 }
 0x104   :  { %v102_v10 = vpop.f32.mrb[2].mxu0 }
 0x105   :  { %v103_v11 = vpop.f32.mrb[3].mxu0  ;;  %106 = vst.msk [vmem:[#allocation7] sm:$0xff] %vm105_vm0, %v100_v8 }
 0x106   :  { %189 = shalt.err (!%p186_p6)
}
 0x107   :  { %s190_s2 = scalar_lea.hbm %s280_s3, 128 }
 0x108   :  { %p191_p7 = scmp.ne.s32.totalorder %s280_s3, %s190_s2  ;;  %p194_p8 = scmp.lt.u32.totalorder %s190_s2, %s280_s3 }
 0x10a   :  { %p196_p9 = pnand %p194_p8, %p191_p7 }
 0x10c   :  { %199 = shalt.err (!%p196_p9)
}
 0x10d   :  { %116 = dma.vmem_to_hbm [thread:$0]  %s114_s1, 128, %s280_s3, [#allocation4]  }
 0x10e   :  { %204 = dma.done.wait [#allocation4], 128  }
 0x10f   :  { %205 = vsyncadd [#allocation4], 4294967168 }
 0x110   :  { %120 = vsyncpa [#allocation3], 1 }
 0x111   :  { %121 = vsyncpa [#allocation6], 1 }
 0x112   :  { %122 = vsyncpa [#allocation4], 1 }

</bundles_post_ra>
